<compile_context>
chip_gen: v7x
topology: tpu7x:2x2x1
jax: 0.10.0
libtpu: 0.0.40
codegen_flags: <defaults>
</compile_context>

<pallas_src>
import functools

import jax
import jax.numpy as jnp
from jax.experimental import pallas as pl
from jax.experimental.pallas import tpu as pltpu

OUT_PAD = 128  # lane-dense padded width of the final (out_features=1) layer


def _round_up(n, m):
    return ((n + m - 1) // m) * m


def _cdiv(a, b):
    return (a + b - 1) // b


def _default_bf16_epilogue():
    """Use a bf16 bias+ReLU epilogue only on chips with bf16 VALUs (v6e/v7x)."""
    try:
        kind = jax.devices()[0].device_kind.lower()
    except Exception:
        return False
    return ("v6" in kind) or ("v7" in kind)


def _dqn_kernel(x_ref, w1_ref, b1_ref, w2_ref, b2_ref, w3_ref, b3_ref,
                w4_ref, b4_ref, o_ref, *, bf16_epilogue):
    """Fused 4-layer MLP forward. Dropout = identity (eval mode)."""
    # TODO(synk): training-mode dropout (random mask + 1/(1-p) scale) via pltpu.prng_* if needed.
    x = x_ref[...].astype(jnp.bfloat16)

    def layer(h, w_ref, b_ref):
        # MXU matmul: bf16 operands, f32 accumulation.
        acc = jnp.dot(h, w_ref[...], preferred_element_type=jnp.float32)
        if bf16_epilogue:
            # v6e/v7x: cast the MXU result down first, add bf16 bias, ReLU in
            # bf16 (packed VALU, 2x throughput), feed the next matmul directly.
            return jnp.maximum(acc.astype(jnp.bfloat16) + b_ref[...], 0.0)
        # v5e: no bf16 VALUs -> keep the epilogue in f32, cast once for the MXU.
        return jnp.maximum(acc + b_ref[...], 0.0).astype(jnp.bfloat16)

    h = layer(x, w1_ref, b1_ref)   # Linear(in,H)   + ReLU (+Dropout: identity)
    h = layer(h, w2_ref, b2_ref)   # Linear(H,H)    + ReLU (+Dropout: identity)
    h = layer(h, w3_ref, b3_ref)   # Linear(H,H/2)  + ReLU
    # Final layer: w4/b4 are zero-padded to OUT_PAD lanes so the matmul is well
    # shaped (N=128) and the output store is lane-dense (unmasked vst).
    q = jnp.dot(h, w4_ref[...], preferred_element_type=jnp.float32) + b4_ref[...]
    o_ref[...] = q.astype(o_ref.dtype)


def prepare_dqn_params(params, bf16_epilogue):
    """One-time weight prep (hoisted out of the per-call forward): bf16 matmul
    operands, epilogue-dtype biases, and lane-padded final layer."""
    bias_dt = jnp.bfloat16 if bf16_epilogue else jnp.float32
    H2 = params["w3"].shape[1]
    w4 = jnp.zeros((H2, OUT_PAD), jnp.bfloat16).at[:, :1].set(
        params["w4"].astype(jnp.bfloat16))
    b4 = jnp.zeros((1, OUT_PAD), jnp.float32).at[:, :1].set(
        params["b4"].astype(jnp.float32))
    return dict(
        w1=params["w1"].astype(jnp.bfloat16), b1=params["b1"].astype(bias_dt),
        w2=params["w2"].astype(jnp.bfloat16), b2=params["b2"].astype(bias_dt),
        w3=params["w3"].astype(jnp.bfloat16), b3=params["b3"].astype(bias_dt),
        w4=w4, b4=b4)


@functools.partial(jax.jit, static_argnames=("bm", "bf16_epilogue"))
def dqn_forward(x, prepped, *, bm=1024, bf16_epilogue=True):
    """x: [B, input_size] float32. prepped: output of prepare_dqn_params.

    Returns [B, 1] float32 Q-values.
    """
    B, D = x.shape
    H = prepped["w1"].shape[1]
    H2 = prepped["w3"].shape[1]

    # --- batch tiling --------------------------------------------------------
    B8 = _round_up(B, 8)
    # For large batches force >= 2 grid steps so v7x's two TensorCores both get
    # work; balance the tile so the last step isn't mostly padding.
    min_steps = 2 if B8 >= 256 else 1
    steps = max(min_steps, _cdiv(B8, bm))
    bm_eff = max(8, _round_up(_cdiv(B8, steps), 8))
    grid = _cdiv(B, bm_eff)
    B_pad = grid * bm_eff
    if B_pad != B:
        x = jnp.pad(x, ((0, B_pad - B), (0, 0)))

    full = lambda shape: pl.BlockSpec(shape, lambda i: (0, 0))

    out = pl.pallas_call(
        functools.partial(_dqn_kernel, bf16_epilogue=bf16_epilogue),
        # bf16 output halves the (padded, 128-wide) writeback; wrapper restores f32.
        out_shape=jax.ShapeDtypeStruct((B_pad, OUT_PAD), jnp.bfloat16),
        grid_spec=pltpu.PrefetchScalarGridSpec(
            num_scalar_prefetch=0,
            grid=(grid,),
            in_specs=[
                pl.BlockSpec((bm_eff, D), lambda i: (i, 0)),   # x tile
                full((D, H)), full((1, H)),                    # layer 1
                full((H, H)), full((1, H)),                    # layer 2
                full((H, H2)), full((1, H2)),                  # layer 3
                full((H2, OUT_PAD)), full((1, OUT_PAD)),       # layer 4 (padded)
            ],
            out_specs=pl.BlockSpec((bm_eff, OUT_PAD), lambda i: (i, 0)),
        ),
        compiler_params=pltpu.CompilerParams(
            dimension_semantics=("parallel",)),
    )(x, prepped["w1"], prepped["b1"], prepped["w2"], prepped["b2"],
      prepped["w3"], prepped["b3"], prepped["w4"], prepped["b4"])

    return out[:B, :1].astype(jnp.float32)


def init_dqn_params(key, input_size, hidden_size=256):
    """PyTorch-style init: U(-1/sqrt(fan_in), +1/sqrt(fan_in))."""
    def linear(k, fan_in, fan_out):
        kw, kb = jax.random.split(k)
        bound = 1.0 / jnp.sqrt(jnp.float32(fan_in))
        w = jax.random.uniform(kw, (fan_in, fan_out), jnp.float32, -bound, bound)
        b = jax.random.uniform(kb, (1, fan_out), jnp.float32, -bound, bound)
        return w, b

    k1, k2, k3, k4 = jax.random.split(key, 4)
    w1, b1 = linear(k1, input_size, hidden_size)
    w2, b2 = linear(k2, hidden_size, hidden_size)
    w3, b3 = linear(k3, hidden_size, hidden_size // 2)
    w4, b4 = linear(k4, hidden_size // 2, 1)
    return dict(w1=w1, b1=b1, w2=w2, b2=b2, w3=w3, b3=b3, w4=w4, b4=b4)


def dqn_reference(x, p):
    """Pure-JAX f32 reference for correctness check (eval-mode dropout)."""
    h = jax.nn.relu(x @ p["w1"] + p["b1"])
    h = jax.nn.relu(h @ p["w2"] + p["b2"])
    h = jax.nn.relu(h @ p["w3"] + p["b3"])
    return h @ p["w4"] + p["b4"]


if __name__ == "__main__":
    key = jax.random.PRNGKey(0)
    k_x, k_x2, k_p = jax.random.split(key, 3)

    input_size = 32
    hidden_size = 256

    params = init_dqn_params(k_p, input_size, hidden_size)
    bf16_ep = _default_bf16_epilogue()
    prepped = prepare_dqn_params(params, bf16_ep)   # one-time weight prep

    # Small batch (single grid step).
    x = jax.random.normal(k_x, (8, input_size), dtype=jnp.float32)
    out = jax.block_until_ready(dqn_forward(x, prepped, bf16_epilogue=bf16_ep))
    ref = dqn_reference(x, params)
    assert out.shape == (8, 1), out.shape
    # Tolerance accounts for bf16 matmul operands / epilogue (f32 accumulation).
    assert jnp.allclose(out, ref, atol=5e-2, rtol=5e-2), "mismatch vs reference (B=8)"

    # Awkward larger batch: exercises balanced multi-step grid + row padding.
    x2 = jax.random.normal(k_x2, (260, input_size), dtype=jnp.float32)
    out2 = jax.block_until_ready(dqn_forward(x2, prepped, bf16_epilogue=bf16_ep))
    ref2 = dqn_reference(x2, params)
    assert out2.shape == (260, 1), out2.shape
    assert jnp.allclose(out2, ref2, atol=5e-2, rtol=5e-2), "mismatch vs reference (B=260)"

    print("KERNEL_OK")
</pallas_src>

<mosaic_0001>
module attributes {stable_mosaic.version = 11 : i64} {
  func.func @_dqn_kernel(%arg0: i32, %arg1: memref<8x32xf32, #tpu.memory_space<vmem>>, %arg2: memref<32x256xbf16, #tpu.memory_space<vmem>>, %arg3: memref<1x256xf32, #tpu.memory_space<vmem>>, %arg4: memref<256x256xbf16, #tpu.memory_space<vmem>>, %arg5: memref<1x256xf32, #tpu.memory_space<vmem>>, %arg6: memref<256x128xbf16, #tpu.memory_space<vmem>>, %arg7: memref<1x128xf32, #tpu.memory_space<vmem>>, %arg8: memref<128x128xbf16, #tpu.memory_space<vmem>>, %arg9: memref<1x128xf32, #tpu.memory_space<vmem>>, %arg10: memref<8x128xbf16, #tpu.memory_space<vmem>>) attributes {dimension_semantics = [#tpu.dimension_semantics<parallel>], iteration_bounds = array<i64: 1>, scalar_prefetch = 0 : i64, scratch_operands = 0 : i64, tpu.core_type = #tpu.core_type<tc>, window_params = [{transform_indices = @transform_0, window_bounds = array<i64: 8, 32>}, {pipeline_mode = #tpu.pipeline_mode<synchronous>, transform_indices = @transform_1, window_bounds = array<i64: 32, 256>}, {pipeline_mode = #tpu.pipeline_mode<synchronous>, transform_indices = @transform_2, window_bounds = array<i64: 1, 256>}, {pipeline_mode = #tpu.pipeline_mode<synchronous>, transform_indices = @transform_3, window_bounds = array<i64: 256, 256>}, {pipeline_mode = #tpu.pipeline_mode<synchronous>, transform_indices = @transform_4, window_bounds = array<i64: 1, 256>}, {pipeline_mode = #tpu.pipeline_mode<synchronous>, transform_indices = @transform_5, window_bounds = array<i64: 256, 128>}, {pipeline_mode = #tpu.pipeline_mode<synchronous>, transform_indices = @transform_6, window_bounds = array<i64: 1, 128>}, {pipeline_mode = #tpu.pipeline_mode<synchronous>, transform_indices = @transform_7, window_bounds = array<i64: 128, 128>}, {pipeline_mode = #tpu.pipeline_mode<synchronous>, transform_indices = @transform_8, window_bounds = array<i64: 1, 128>}, {transform_indices = @transform_9, window_bounds = array<i64: 8, 128>}]} {
    %c0 = arith.constant 0 : index
    %c0_0 = arith.constant 0 : index
    %0 = vector.load %arg1[%c0, %c0_0] : memref<8x32xf32, #tpu.memory_space<vmem>>, vector<8x32xf32>
    %1 = arith.truncf %0 : vector<8x32xf32> to vector<8x32xbf16>
    %c0_1 = arith.constant 0 : index
    %c0_2 = arith.constant 0 : index
    %2 = vector.load %arg2[%c0_1, %c0_2] : memref<32x256xbf16, #tpu.memory_space<vmem>>, vector<32x256xbf16>
    %cst = arith.constant dense<0.000000e+00> : vector<8x256xf32>
    %3 = tpu.matmul %1, %2, %cst {dimension_numbers = #tpu.dot_dimension_numbers<[1], [0], [0], [1], [0, 0, 1, 1], [], []>} : vector<8x32xbf16>, vector<32x256xbf16>, vector<8x256xf32> -> vector<8x256xf32>
    %c0_3 = arith.constant 0 : index
    %c0_4 = arith.constant 0 : index
    %4 = vector.load %arg3[%c0_3, %c0_4] : memref<1x256xf32, #tpu.memory_space<vmem>>, vector<1x256xf32>
    %5 = vector.broadcast %4 : vector<1x256xf32> to vector<8x256xf32>
    %6 = arith.addf %3, %5 : vector<8x256xf32>
    %cst_5 = arith.constant 0.000000e+00 : f32
    %7 = vector.broadcast %cst_5 : f32 to vector<8x256xf32>
    %8 = arith.maximumf %6, %7 : vector<8x256xf32>
    %9 = arith.truncf %8 : vector<8x256xf32> to vector<8x256xbf16>
    %c0_6 = arith.constant 0 : index
    %c0_7 = arith.constant 0 : index
    %10 = vector.load %arg4[%c0_6, %c0_7] : memref<256x256xbf16, #tpu.memory_space<vmem>>, vector<256x256xbf16>
    %cst_8 = arith.constant dense<0.000000e+00> : vector<8x256xf32>
    %11 = tpu.matmul %9, %10, %cst_8 {dimension_numbers = #tpu.dot_dimension_numbers<[1], [0], [0], [1], [0, 0, 1, 1], [], []>} : vector<8x256xbf16>, vector<256x256xbf16>, vector<8x256xf32> -> vector<8x256xf32>
    %c0_9 = arith.constant 0 : index
    %c0_10 = arith.constant 0 : index
    %12 = vector.load %arg5[%c0_9, %c0_10] : memref<1x256xf32, #tpu.memory_space<vmem>>, vector<1x256xf32>
    %13 = vector.broadcast %12 : vector<1x256xf32> to vector<8x256xf32>
    %14 = arith.addf %11, %13 : vector<8x256xf32>
    %cst_11 = arith.constant 0.000000e+00 : f32
    %15 = vector.broadcast %cst_11 : f32 to vector<8x256xf32>
    %16 = arith.maximumf %14, %15 : vector<8x256xf32>
    %17 = arith.truncf %16 : vector<8x256xf32> to vector<8x256xbf16>
    %c0_12 = arith.constant 0 : index
    %c0_13 = arith.constant 0 : index
    %18 = vector.load %arg6[%c0_12, %c0_13] : memref<256x128xbf16, #tpu.memory_space<vmem>>, vector<256x128xbf16>
    %cst_14 = arith.constant dense<0.000000e+00> : vector<8x128xf32>
    %19 = tpu.matmul %17, %18, %cst_14 {dimension_numbers = #tpu.dot_dimension_numbers<[1], [0], [0], [1], [0, 0, 1, 1], [], []>} : vector<8x256xbf16>, vector<256x128xbf16>, vector<8x128xf32> -> vector<8x128xf32>
    %c0_15 = arith.constant 0 : index
    %c0_16 = arith.constant 0 : index
    %20 = vector.load %arg7[%c0_15, %c0_16] : memref<1x128xf32, #tpu.memory_space<vmem>>, vector<1x128xf32>
    %21 = vector.broadcast %20 : vector<1x128xf32> to vector<8x128xf32>
    %22 = arith.addf %19, %21 : vector<8x128xf32>
    %cst_17 = arith.constant 0.000000e+00 : f32
    %23 = vector.broadcast %cst_17 : f32 to vector<8x128xf32>
    %24 = arith.maximumf %22, %23 : vector<8x128xf32>
    %25 = arith.truncf %24 : vector<8x128xf32> to vector<8x128xbf16>
    %c0_18 = arith.constant 0 : index
    %c0_19 = arith.constant 0 : index
    %26 = vector.load %arg8[%c0_18, %c0_19] : memref<128x128xbf16, #tpu.memory_space<vmem>>, vector<128x128xbf16>
    %cst_20 = arith.constant dense<0.000000e+00> : vector<8x128xf32>
    %27 = tpu.matmul %25, %26, %cst_20 {dimension_numbers = #tpu.dot_dimension_numbers<[1], [0], [0], [1], [0, 0, 1, 1], [], []>} : vector<8x128xbf16>, vector<128x128xbf16>, vector<8x128xf32> -> vector<8x128xf32>
    %c0_21 = arith.constant 0 : index
    %c0_22 = arith.constant 0 : index
    %28 = vector.load %arg9[%c0_21, %c0_22] : memref<1x128xf32, #tpu.memory_space<vmem>>, vector<1x128xf32>
    %29 = vector.broadcast %28 : vector<1x128xf32> to vector<8x128xf32>
    %30 = arith.addf %27, %29 : vector<8x128xf32>
    %31 = arith.truncf %30 : vector<8x128xf32> to vector<8x128xbf16>
    %c0_23 = arith.constant 0 : index
    %c0_24 = arith.constant 0 : index
    %32 = vector.load %arg10[%c0_23, %c0_24] : memref<8x128xbf16, #tpu.memory_space<vmem>>, vector<8x128xbf16>
    tpu.vector_store %arg10[%c0_23, %c0_24], %31 {strides = array<i32>} : memref<8x128xbf16, #tpu.memory_space<vmem>>, vector<8x128xbf16>,
    return
  }
  func.func @transform_0(%arg0: i32) -> (i32, i32) {
    %c0_i32 = arith.constant 0 : i32
    %c0_i32_0 = arith.constant 0 : i32
    return %arg0, %c0_i32 : i32, i32
  }
  func.func @transform_1(%arg0: i32) -> (i32, i32) {
    %c0_i32 = arith.constant 0 : i32
    %c0_i32_0 = arith.constant 0 : i32
    %c0_i32_1 = arith.constant 0 : i32
    return %c0_i32, %c0_i32_0 : i32, i32
  }
  func.func @transform_2(%arg0: i32) -> (i32, i32) {
    %c0_i32 = arith.constant 0 : i32
    %c0_i32_0 = arith.constant 0 : i32
    %c0_i32_1 = arith.constant 0 : i32
    return %c0_i32, %c0_i32_0 : i32, i32
  }
  func.func @transform_3(%arg0: i32) -> (i32, i32) {
    %c0_i32 = arith.constant 0 : i32
    %c0_i32_0 = arith.constant 0 : i32
    %c0_i32_1 = arith.constant 0 : i32
    return %c0_i32, %c0_i32_0 : i32, i32
  }
  func.func @transform_4(%arg0: i32) -> (i32, i32) {
    %c0_i32 = arith.constant 0 : i32
    %c0_i32_0 = arith.constant 0 : i32
    %c0_i32_1 = arith.constant 0 : i32
    return %c0_i32, %c0_i32_0 : i32, i32
  }
  func.func @transform_5(%arg0: i32) -> (i32, i32) {
    %c0_i32 = arith.constant 0 : i32
    %c0_i32_0 = arith.constant 0 : i32
    %c0_i32_1 = arith.constant 0 : i32
    return %c0_i32, %c0_i32_0 : i32, i32
  }
  func.func @transform_6(%arg0: i32) -> (i32, i32) {
    %c0_i32 = arith.constant 0 : i32
    %c0_i32_0 = arith.constant 0 : i32
    %c0_i32_1 = arith.constant 0 : i32
    return %c0_i32, %c0_i32_0 : i32, i32
  }
  func.func @transform_7(%arg0: i32) -> (i32, i32) {
    %c0_i32 = arith.constant 0 : i32
    %c0_i32_0 = arith.constant 0 : i32
    %c0_i32_1 = arith.constant 0 : i32
    return %c0_i32, %c0_i32_0 : i32, i32
  }
  func.func @transform_8(%arg0: i32) -> (i32, i32) {
    %c0_i32 = arith.constant 0 : i32
    %c0_i32_0 = arith.constant 0 : i32
    %c0_i32_1 = arith.constant 0 : i32
    return %c0_i32, %c0_i32_0 : i32, i32
  }
  func.func @transform_9(%arg0: i32) -> (i32, i32) {
    %c0_i32 = arith.constant 0 : i32
    %c0_i32_0 = arith.constant 0 : i32
    return %arg0, %c0_i32 : i32, i32
  }
}

</mosaic_0001>

<bundles_post_ra>
// kernel: dqn_forward.1
= control target key start
LH: loop header
LB: loop body
LE: loop exit
PB: predicated region body
PF: predicated region fallthrough
CT: control target
= control target key end

     0   :  { %14 = vsyncpa [#allocation3], 0  ;;  %s1208_s0 = inlined_call_operand.hbm [shape: f32[8,32], index: 0, kind: input, shape index: {}]   ;;  %s1209_s1 = inlined_call_operand.hbm [shape: bf16[32,256], index: 1, kind: input, shape index: {}]   ;;  %s1210_s2 = inlined_call_operand.vmem [shape: f32[1,256], index: 2, kind: input, shape index: {}]   ;;  %s1211_s3 = inlined_call_operand.hbm [shape: bf16[256,256], index: 3, kind: input, shape index: {}]   ;;  %s1212_s4 = inlined_call_operand.vmem [shape: f32[1,256], index: 4, kind: input, shape index: {}]   ;;  %s1213_s5 = inlined_call_operand.hbm [shape: bf16[256,128], index: 5, kind: input, shape index: {}]   ;;  %s1214_s6 = inlined_call_operand.vmem [shape: f32[1,128], index: 6, kind: input, shape index: {}]   ;;  %s1215_s7 = inlined_call_operand.hbm [shape: bf16[128,128], index: 7, kind: input, shape index: {}]   ;;  %s1216_s8 = inlined_call_operand.vmem [shape: f32[1,128], index: 8, kind: input, shape index: {}]   ;;  %s1217_s9 = inlined_call_operand.vmem [shape: bf16[8,128], index: 9, kind: output, shape index: {}]  }
   0x1   :  { %15 = vsyncpa [#allocation5], 0 }
   0x2   :  { %16 = vsyncpa [#allocation8], 0  ;;  %s1052_s30 = smov [#allocation4]   ;;  %s936_s13 = scalar_lea.hbm %s1209_s1, 512 }
   0x3   :  { %s32_s10 = sshll.u32 %s1052_s30, 4  ;;  %p937_p0 = scmp.ne.s32.totalorder %s1209_s1, %s936_s13  ;;  %s33_s10 = int_to_ptr.vmem [resolvable:$true] %s32_s10 }
   0x4   :  { %p940_p1 = scmp.lt.u32.totalorder %s936_s13, %s1209_s1 }
   0x6   :  { %p942_p2 = pnand %p940_p1, %p937_p0 }
   0x8   :  { %945 = shalt.err (!%p942_p2)
}
   0x9   :  { %s946_s18 = scalar_lea.vmem %s33_s10, 512  ;;  %p951_p4 = scmp.lt.s32.totalorder %s33_s10, %s33_s10 }
   0xa   :  { %p947_p3 = scmp.ne.s32.totalorder %s33_s10, %s946_s18  ;;  %p952_p5 = scmp.lt.s32.totalorder %s946_s18, %s946_s18 }
   0xc   :  { %p953_p6 = por %p952_p5, %p951_p4 }
   0xe   :  { %p954_p7 = pnand %p953_p6, %p947_p3 }
  0x10   :  { %957 = shalt.err (!%p954_p7)
}
  0x11   :  { %s1053_s19 = smov 128   ;;  %s1054_s20 = smov 8  }
  0x12   :  { %38 = dma.hbm_to_vmem [thread:$0]  %s1209_s1, 512, %s33_s10, [#allocation5], %s1053_s19, %s1053_s19, %s1054_s20  }
  0x13   :  { %s1055_s23 = smov [#allocation7]   ;;  %s958_s27 = scalar_lea.hbm %s1213_s5, 2048 }
  0x14   :  { %s60_s24 = sshll.u32 %s1055_s23, 4  ;;  %p959_p8 = scmp.ne.s32.totalorder %s1213_s5, %s958_s27  ;;  %s61_s24 = int_to_ptr.vmem [resolvable:$true] %s60_s24 }
  0x15   :  { %p962_p9 = scmp.lt.u32.totalorder %s958_s27, %s1213_s5 }
  0x17   :  { %p964_p10 = pnand %p962_p9, %p959_p8 }
  0x19   :  { %967 = shalt.err (!%p964_p10)
}
  0x1a   :  { %s968_s12 = scalar_lea.vmem %s61_s24, 2048  ;;  %p973_p12 = scmp.lt.s32.totalorder %s61_s24, %s61_s24 }
  0x1b   :  { %p969_p11 = scmp.ne.s32.totalorder %s61_s24, %s968_s12  ;;  %p974_p13 = scmp.lt.s32.totalorder %s968_s12, %s968_s12 }
  0x1d   :  { %p975_p0 = por %p974_p13, %p973_p12 }
  0x1f   :  { %p976_p1 = pnand %p975_p0, %p969_p11 }
  0x21   :  { %979 = shalt.err (!%p976_p1)
}
  0x22   :  { %s1056_s1 = smov 64   ;;  %s1057_s10 = smov 4  }
  0x23   :  { %66 = dma.hbm_to_vmem [thread:$0]  %s1213_s5, 2048, %s61_s24, [#allocation8], %s1056_s1, %s1056_s1, %s1057_s10  }
  0x24   :  { %s1058_s15 = smov [#allocation2]   ;;  %s1059_s17 = smov [#allocation6]  }
  0x25   :  { %s23_s16 = sshll.u32 %s1058_s15, 4  ;;  %s46_s18 = sshll.u32 %s1059_s17, 4  ;;  %s24_s16 = int_to_ptr.vmem [resolvable:$true] %s23_s16  ;;  %s1144_s18 = int_to_ptr.vmem [resolvable:$true] %s46_s18 }
  0x26   :  { %s980_s23 = scalar_lea.hbm %s1208_s0, 128 }
  0x27   :  { %p981_p2 = scmp.ne.s32.totalorder %s1208_s0, %s980_s23  ;;  %p984_p3 = scmp.lt.u32.totalorder %s980_s23, %s1208_s0 }
  0x29   :  { %p986_p4 = pnand %p984_p3, %p981_p2 }
  0x2b   :  { %989 = shalt.err (!%p986_p4)
}
  0x2c   :  { %s990_s5 = scalar_lea.vmem %s24_s16, 128  ;;  %p995_p6 = scmp.lt.s32.totalorder %s24_s16, %s24_s16 }
  0x2d   :  { %p991_p5 = scmp.ne.s32.totalorder %s24_s16, %s990_s5  ;;  %p996_p7 = scmp.lt.s32.totalorder %s990_s5, %s990_s5 }
  0x2f   :  { %p997_p8 = por %p996_p7, %p995_p6 }
  0x31   :  { %p998_p9 = pnand %p997_p8, %p991_p5 }
  0x33   :  { %1001 = shalt.err (!%p998_p9)
}
  0x34   :  { %26 = dma.hbm_to_vmem [thread:$0]  %s1208_s0, 128, %s24_s16, [#allocation3]  }
  0x35   :  { %s1002_s12 = scalar_lea.hbm %s1211_s3, 4096 }
  0x36   :  { %p1003_p10 = scmp.ne.s32.totalorder %s1211_s3, %s1002_s12  ;;  %p1006_p11 = scmp.lt.u32.totalorder %s1002_s12, %s1211_s3 }
  0x38   :  { %p1008_p12 = pnand %p1006_p11, %p1003_p10 }
  0x3a   :  { %1011 = shalt.err (!%p1008_p12)
}
  0x3b   :  { %s1012_s21 = scalar_lea.vmem %s1144_s18, 4096  ;;  %p1017_p0 = scmp.lt.s32.totalorder %s1144_s18, %s1144_s18 }
  0x3c   :  { %p1013_p13 = scmp.ne.s32.totalorder %s1144_s18, %s1012_s21  ;;  %p1018_p1 = scmp.lt.s32.totalorder %s1012_s21, %s1012_s21 }
  0x3e   :  { %p1019_p2 = por %p1018_p1, %p1017_p0 }
  0x40   :  { %p1020_p3 = pnand %p1019_p2, %p1013_p13 }
  0x42   :  { %1023 = shalt.err (!%p1020_p3)
}
  0x43   :  { %52 = dma.hbm_to_vmem [thread:$0]  %s1211_s3, 4096, %s1144_s18, [#allocation5], %s1053_s19, %s1053_s19, %s1054_s20  }
  0x44   :  { %s1060_s22 = smov [#allocation9]   ;;  %s1024_s27 = scalar_lea.hbm %s1215_s7, 1024 }
  0x45   :  { %s74_s23 = sshll.u32 %s1060_s22, 4  ;;  %p1025_p4 = scmp.ne.s32.totalorder %s1215_s7, %s1024_s27  ;;  %s75_s23 = int_to_ptr.vmem [resolvable:$true] %s74_s23 }
  0x46   :  { %p1028_p5 = scmp.lt.u32.totalorder %s1024_s27, %s1215_s7 }
  0x48   :  { %p1030_p6 = pnand %p1028_p5, %p1025_p4 }
  0x4a   :  { %1033 = shalt.err (!%p1030_p6)
}
  0x4b   :  { %s1034_s30 = scalar_lea.vmem %s75_s23, 1024  ;;  %p1039_p8 = scmp.lt.s32.totalorder %s75_s23, %s75_s23 }
  0x4c   :  { %p1035_p7 = scmp.ne.s32.totalorder %s75_s23, %s1034_s30  ;;  %p1040_p9 = scmp.lt.s32.totalorder %s1034_s30, %s1034_s30 }
  0x4e   :  { %p1041_p10 = por %p1040_p9, %p1039_p8 }
  0x50   :  { %p1042_p11 = pnand %p1041_p10, %p1035_p7 }
  0x52   :  { %1045 = shalt.err (!%p1042_p11)
}
  0x53   :  { %80 = dma.hbm_to_vmem [thread:$0]  %s1215_s7, 1024, %s75_s23, [#allocation8], %s1056_s1, %s1056_s1, %s1057_s10  }
  0x54   :  { %1046 = dma.done.wait [#allocation3], 128  }
  0x55   :  { %1047 = vsyncadd [#allocation3], 4294967168 }
  0x56   :  { %1048 = dma.done.wait [#allocation5], 4608  }
  0x57   :  { %1049 = vsyncadd [#allocation5], 4294962688 }
  0x58   :  { %1050 = dma.done.wait [#allocation8], 3072  }
  0x59   :  { %1051 = vsyncadd [#allocation8], 4294964224  ;;  %v1061_v0 = vmov 0   ;;  %v858_v1 = vld [vmem:[#allocation4 + $0x4] ss:$8 sps:$4 sm:$0xff]   ;;  %v99_v5 = vld [vmem:[#allocation2] sm:$0xff]  ;;  %v107_v51 = vlaneseq }
  0x5a   :  { %173 = vmatprep.mubr.bf16.mxu0 %v1061_v0  ;;  %v860_v2 = vld [vmem:[#allocation4] ss:$8 sps:$4 sm:$0xff]   ;;  %141 = vmatprep.subr.bf16.mxu0 %v858_v1  ;;  %v861_v3 = vld [vmem:[#allocation4 + $0x14] ss:$8 sps:$4 sm:$0xff]   ;;  %v863_v4 = vld [vmem:[#allocation4 + $0x10] ss:$8 sps:$4 sm:$0xff]   ;;  %v100_v9 = vpack.c.bf16 %v99_v5, %v99_v5 }
  0x5b   :  { %142 = vmatpush1.bf16.msra.mxu0 %v860_v2  ;;  %v864_v6 = vld [vmem:[#allocation6 + $0x4] ss:$8 sps:$4 sm:$0xff]   ;;  %v866_v7 = vld [vmem:[#allocation6] ss:$8 sps:$4 sm:$0xff]   ;;  %v867_v8 = vld [vmem:[#allocation6 + $0x14] ss:$8 sps:$4 sm:$0xff]  }
  0x5c   :  { %143 = vmatprep.subr.bf16.mxu0 %v861_v3  ;;  %390 = vmatprep.subr.bf16.mxu1 %v864_v6  ;;  %v869_v10 = vld [vmem:[#allocation6 + $0x10] ss:$8 sps:$4 sm:$0xff]   ;;  %vm137_vm0 = vcmask 261120   ;;  %v870_v11 = vld [vmem:[#allocation6 + $0x24] ss:$8 sps:$4 sm:$0xff]   ;;  %v108_v52 = vshrl.u32 %v107_v51, 7 }
  0x5d   :  { %391 = vmatpush1.bf16.msra.mxu1 %v866_v7  ;;  %v872_v12 = vld [vmem:[#allocation6 + $0x20] ss:$8 sps:$4 sm:$0xff]   ;;  %v873_v13 = vld [vmem:[#allocation6 + $0x34] ss:$8 sps:$4 sm:$0xff]   ;;  %v875_v14 = vld [vmem:[#allocation6 + $0x30] ss:$8 sps:$4 sm:$0xff]  }
  0x5e   :  { %392 = vmatprep.subr.bf16.mxu1 %v867_v8  ;;  %v876_v15 = vld [vmem:[#allocation6 + $0x44] ss:$8 sps:$4 sm:$0xff]   ;;  %v878_v16 = vld [vmem:[#allocation6 + $0x40] ss:$8 sps:$4 sm:$0xff]   ;;  %v879_v17 = vld [vmem:[#allocation6 + $0x54] ss:$8 sps:$4 sm:$0xff]  }
  0x5f   :  { %144 = vmatpush1.bf16.msra.mxu0 %v863_v4  ;;  %v881_v18 = vld [vmem:[#allocation6 + $0x50] ss:$8 sps:$4 sm:$0xff]   ;;  %v882_v19 = vld [vmem:[#allocation6 + $0x64] ss:$8 sps:$4 sm:$0xff]   ;;  %v884_v20 = vld [vmem:[#allocation6 + $0x60] ss:$8 sps:$4 sm:$0xff]  }
  0x60   :  { %v885_v21 = vld [vmem:[#allocation6 + $0x74] ss:$8 sps:$4 sm:$0xff]   ;;  %v887_v22 = vld [vmem:[#allocation6 + $0x70] ss:$8 sps:$4 sm:$0xff]   ;;  %v888_v23 = vld [vmem:[#allocation6 + $0x84] ss:$8 sps:$4 sm:$0xff]  }
  0x61   :  { %393 = vmatpush1.bf16.msra.mxu1 %v869_v10  ;;  %v890_v24 = vld [vmem:[#allocation6 + $0x80] ss:$8 sps:$4 sm:$0xff]   ;;  %v891_v25 = vld [vmem:[#allocation6 + $0x94] ss:$8 sps:$4 sm:$0xff]   ;;  %v893_v26 = vld [vmem:[#allocation6 + $0x90] ss:$8 sps:$4 sm:$0xff]  }
  0x62   :  { %736 = vmatmul.mubr.msk.bf16.vlgmr.msra.gmra.mrb[0].mxu0 %vm137_vm0, %v100_v9  ;;  %394 = vmatprep.subr.bf16.mxu1 %v870_v11  ;;  %v894_v27 = vld [vmem:[#allocation6 + $0xa4] ss:$8 sps:$4 sm:$0xff]   ;;  %v896_v28 = vld [vmem:[#allocation6 + $0xa0] ss:$8 sps:$4 sm:$0xff]   ;;  %v897_v29 = vld [vmem:[#allocation6 + $0xb4] ss:$8 sps:$4 sm:$0xff]  }
  0x63   :  { %v899_v30 = vld [vmem:[#allocation6 + $0xb0] ss:$8 sps:$4 sm:$0xff]   ;;  %v900_v31 = vld [vmem:[#allocation6 + $0xc4] ss:$8 sps:$4 sm:$0xff]   ;;  %v902_v32 = vld [vmem:[#allocation6 + $0xc0] ss:$8 sps:$4 sm:$0xff]  }
  0x64   :  { %v903_v33 = vld [vmem:[#allocation6 + $0xd4] ss:$8 sps:$4 sm:$0xff]   ;;  %v905_v34 = vld [vmem:[#allocation6 + $0xd0] ss:$8 sps:$4 sm:$0xff]   ;;  %v906_v35 = vld [vmem:[#allocation6 + $0xe4] ss:$8 sps:$4 sm:$0xff]  }
  0x65   :  { %395 = vmatpush1.bf16.msra.mxu1 %v872_v12  ;;  %v908_v36 = vld [vmem:[#allocation6 + $0xe0] ss:$8 sps:$4 sm:$0xff]   ;;  %v909_v37 = vld [vmem:[#allocation6 + $0xf4] ss:$8 sps:$4 sm:$0xff]   ;;  %v911_v38 = vld [vmem:[#allocation6 + $0xf0] ss:$8 sps:$4 sm:$0xff]  }
  0x66   :  { %396 = vmatprep.subr.bf16.mxu1 %v873_v13  ;;  %v912_v39 = vld [vmem:[#allocation7 + $0x40] sm:$0xff]   ;;  %v914_v41 = vld [vmem:[#allocation7 + $0x48] sm:$0xff]   ;;  %v916_v43 = vld [vmem:[#allocation7 + $0x50] sm:$0xff]   ;;  %v109_v53 = vsub.s32 0, %v108_v52  ;;  %v113_v55 = vsub.s32 1, %v108_v52  ;;  %v1062_v8 = vmov 0.0  }
  0x67   :  { %v913_v40 = vld [vmem:[#allocation7] sm:$0xff]   ;;  %795 = vmatprep.subr.bf16.mxu0 %v912_v39  ;;  %v915_v42 = vld [vmem:[#allocation7 + $0x8] sm:$0xff]   ;;  %v917_v44 = vld [vmem:[#allocation7 + $0x10] sm:$0xff]   ;;  %vm1063_vm1 = vmmov 0  }
  0x68   :  { %796 = vmatpush3.bf16.msra.mxu0 %v913_v40  ;;  %v918_v45 = vld [vmem:[#allocation7 + $0x58] sm:$0xff]   ;;  %v920_v47 = vld [vmem:[#allocation7 + $0x60] sm:$0xff]   ;;  %v922_v49 = vld [vmem:[#allocation7 + $0x68] sm:$0xff]  }
  0x69   :  { %397 = vmatpush1.bf16.msra.mxu1 %v875_v14  ;;  %797 = vmatprep.subr.bf16.mxu0 %v914_v41  ;;  %v919_v46 = vld [vmem:[#allocation7 + $0x18] sm:$0xff]   ;;  %v921_v48 = vld [vmem:[#allocation7 + $0x20] sm:$0xff]   ;;  %v923_v50 = vld [vmem:[#allocation7 + $0x28] sm:$0xff]  }
  0x6a   :  { %398 = vmatprep.subr.bf16.mxu1 %v876_v15  ;;  %v105_v54 = vld [vmem:[%s1210_s2] sm:$0x3]  ;;  %v924_v4 = vld [vmem:[#allocation7 + $0x70] sm:$0xff]  }
  0x6b   :  { %v110_v56 = vrot.slane %v105_v54, %v109_v53  ;;  %v114_v57 = vrot.slane %v105_v54, %v113_v55  ;;  %v925_v5 = vld [vmem:[#allocation7 + $0x30] sm:$0xff]   ;;  %v926_v6 = vld [vmem:[#allocation7 + $0x78] sm:$0xff]  }
  0x6c   :  { %798 = vmatpush3.bf16.msra.mxu0 %v915_v42  ;;  %v927_v7 = vld [vmem:[#allocation7 + $0x38] sm:$0xff]  }
  0x6d   :  { %399 = vmatpush1.bf16.msra.mxu1 %v878_v16  ;;  %799 = vmatprep.subr.bf16.mxu0 %v916_v43  ;;  %v218_v9 = vld [vmem:[%s1212_s4] sm:$0x3] }
  0x6e   :  { %400 = vmatprep.subr.bf16.mxu1 %v879_v17  ;;  %v223_v10 = vrot.slane %v218_v9, %v109_v53  ;;  %v227_v11 = vrot.slane %v218_v9, %v113_v55  ;;  %v786_v39 = vld [vmem:[%s1216_s8] ss:$0 sm:$0xff] }
  0x70   :  { %800 = vmatpush3.bf16.msra.mxu0 %v917_v44 }
  0x71   :  { %401 = vmatpush1.bf16.msra.mxu1 %v881_v18  ;;  %801 = vmatprep.subr.bf16.mxu0 %v918_v45 }
  0x72   :  { %402 = vmatprep.subr.bf16.mxu1 %v882_v19 }
  0x74   :  { %802 = vmatpush3.bf16.msra.mxu0 %v919_v46 }
  0x75   :  { %403 = vmatpush1.bf16.msra.mxu1 %v884_v20  ;;  %803 = vmatprep.subr.bf16.mxu0 %v920_v47 }
  0x76   :  { %404 = vmatprep.subr.bf16.mxu1 %v885_v21  ;;  %v928_v21 = vld [vmem:[#allocation9] sm:$0xff]  }
  0x78   :  { %804 = vmatpush3.bf16.msra.mxu0 %v921_v48 }
  0x79   :  { %405 = vmatpush1.bf16.msra.mxu1 %v887_v22  ;;  %805 = vmatprep.subr.bf16.mxu0 %v922_v49 }
  0x7a   :  { %406 = vmatprep.subr.bf16.mxu1 %v888_v23  ;;  %v929_v23 = vld [vmem:[#allocation9 + $0x8] sm:$0xff]  }
  0x7c   :  { %806 = vmatpush3.bf16.msra.mxu0 %v923_v50 }
  0x7d   :  { %407 = vmatpush1.bf16.msra.mxu1 %v890_v24  ;;  %807 = vmatprep.subr.bf16.mxu0 %v924_v4  ;;  %v930_v24 = vld [vmem:[#allocation9 + $0x10] sm:$0xff]  }
  0x7e   :  { %408 = vmatprep.subr.bf16.mxu1 %v891_v25  ;;  %v931_v25 = vld [vmem:[#allocation9 + $0x18] sm:$0xff]  }
  0x80   :  { %808 = vmatpush3.bf16.msra.mxu0 %v925_v5 }
  0x81   :  { %409 = vmatpush1.bf16.msra.mxu1 %v893_v26  ;;  %809 = vmatprep.subr.bf16.mxu0 %v926_v6  ;;  %v932_v26 = vld [vmem:[#allocation9 + $0x20] sm:$0xff]  }
  0x82   :  { %410 = vmatprep.subr.bf16.mxu1 %v894_v27  ;;  %v933_v27 = vld [vmem:[#allocation9 + $0x28] sm:$0xff]  }
  0x84   :  { %810 = vmatpush3.bf16.msra.mxu0 %v927_v7 }
  0x85   :  { %411 = vmatpush1.bf16.msra.mxu1 %v896_v28  ;;  %826 = vmatprep.subr.bf16.mxu0 %v1062_v8  ;;  %v934_v28 = vld [vmem:[#allocation9 + $0x30] sm:$0xff]  }
  0x86   :  { %412 = vmatprep.subr.bf16.mxu1 %v897_v29  ;;  %v935_v29 = vld [vmem:[#allocation9 + $0x38] sm:$0xff]  }
  0x89   :  { %413 = vmatpush1.bf16.msra.mxu1 %v899_v30 }
  0x8a   :  { %414 = vmatprep.subr.bf16.mxu1 %v900_v31  ;;  %v769_v31 = vld [vmem:[%s1214_s6] ss:$0 sm:$0xff] }
  0x8d   :  { %415 = vmatpush1.bf16.msra.mxu1 %v902_v32 }
  0x8e   :  { %416 = vmatprep.subr.bf16.mxu1 %v903_v33 }
  0x91   :  { %417 = vmatpush1.bf16.msra.mxu1 %v905_v34 }
  0x92   :  { %418 = vmatprep.subr.bf16.mxu1 %v906_v35 }
  0x95   :  { %419 = vmatpush1.bf16.msra.mxu1 %v908_v36 }
  0x96   :  { %420 = vmatprep.subr.bf16.mxu1 %v909_v37 }
  0x99   :  { %421 = vmatpush1.bf16.msra.mxu1 %v911_v38 }
 0x135   :  { %v175_v58 = vpop.f32.mrb[0].mxu0 }
 0x136   :  { %v176_v59 = vadd.f32 %v175_v58, %v110_v56  ;;  %v177_v60 = vpop.f32.mrb[1].mxu0 }
 0x137   :  { %v178_v61 = vadd.f32 %v177_v60, %v114_v57  ;;  %v179_v62 = vpop.f32.mrb[2].mxu0 }
 0x138   :  { %v182_v63 = vmax.f32 %v176_v59, 0.0  ;;  %v180_v0 = vpop.f32.mrb[3].mxu0 }
 0x139   :  { %v183_v1 = vmax.f32 %v178_v61, 0.0 }
 0x13a   :  { %v184_v3 = vpack.c.bf16 %v182_v63, %v182_v63 }
 0x13b   :  { %v185_v2 = vpack.c.bf16 %v183_v1, %v183_v1 }
 0x13d   :  { %422 = vmatprep.mubr.bf16.mxu1 %v185_v2 }
 0x13e   :  { %423 = vmatmul.mubr.bf16.vlgmr.msra.gmra.mrb[0].mxu1 %v184_v3 }
 0x211   :  { %v424_v12 = vpop.f32.mrb[0].mxu1 }
 0x212   :  { %v425_v13 = vadd.f32 %v424_v12, %v223_v10  ;;  %v426_v14 = vpop.f32.mrb[1].mxu1 }
 0x213   :  { %v427_v15 = vadd.f32 %v426_v14, %v227_v11  ;;  %v428_v16 = vpop.f32.mrb[2].mxu1 }
 0x214   :  { %v431_v17 = vmax.f32 %v425_v13, 0.0  ;;  %v429_v18 = vpop.f32.mrb[3].mxu1 }
 0x215   :  { %v432_v19 = vmax.f32 %v427_v15, 0.0 }
 0x216   :  { %v433_v22 = vpack.c.bf16 %v431_v17, %v431_v17 }
 0x217   :  { %v434_v20 = vpack.c.bf16 %v432_v19, %v432_v19 }
 0x219   :  { %602 = vmatprep.mubr.bf16.mxu0 %v434_v20 }
 0x21a   :  { %603 = vmatmul.mubr.bf16.vlgmr.msra.gmra.mrb[4].mxu0 %v433_v22 }
 0x21b   :  { %827 = vmatpush3.bf16.msra.mxu0 %v928_v21  ;;  %842 = vmatprep.mubr.msk.bf16.mxu0 %vm1063_vm1, %v1062_v8 }
 0x21c   :  { %828 = vmatprep.subr.bf16.mxu0 %v1062_v8 }
 0x21f   :  { %829 = vmatpush3.bf16.msra.mxu0 %v929_v23 }
 0x220   :  { %830 = vmatprep.subr.bf16.mxu0 %v1062_v8 }
 0x223   :  { %831 = vmatpush3.bf16.msra.mxu0 %v930_v24 }
 0x224   :  { %832 = vmatprep.subr.bf16.mxu0 %v1062_v8 }
 0x227   :  { %833 = vmatpush3.bf16.msra.mxu0 %v931_v25 }
 0x228   :  { %834 = vmatprep.subr.bf16.mxu0 %v1062_v8 }
 0x22b   :  { %835 = vmatpush3.bf16.msra.mxu0 %v932_v26 }
 0x22c   :  { %836 = vmatprep.subr.bf16.mxu0 %v1062_v8 }
 0x22f   :  { %837 = vmatpush3.bf16.msra.mxu0 %v933_v27 }
 0x230   :  { %838 = vmatprep.subr.bf16.mxu0 %v1062_v8 }
 0x233   :  { %839 = vmatpush3.bf16.msra.mxu0 %v934_v28 }
 0x234   :  { %840 = vmatprep.subr.bf16.mxu0 %v1062_v8 }
 0x237   :  { %841 = vmatpush3.bf16.msra.mxu0 %v935_v29 }
 0x2ed   :  { %v811_v30 = vpop.f32.mrb[4].mxu0 }
 0x2ee   :  { %v812_v32 = vpop.f32.mrb[5].mxu0 }
 0x2ef   :  { %v813_v33 = vadd.f32 %v812_v32, %v811_v30  ;;  %v814_v34 = vpop.f32.mrb[6].mxu0 }
 0x2f0   :  { %v815_v35 = vpop.f32.mrb[7].mxu0 }
 0x2f1   :  { %v605_v36 = vadd.f32 %v813_v33, %v769_v31 }
 0x2f3   :  { %v610_v37 = vmax.f32 %v605_v36, 0.0 }
 0x2f5   :  { %v611_v38 = vpack.c.bf16 %v610_v37, %v610_v37 }
 0x2f7   :  { %843 = vmatmul.mubr.bf16.vlgmr.msra.gmra.mrb[8].mxu0 %v611_v38 }
 0x3ca   :  { %v717_v40 = vpop.f32.mrb[8].mxu0 }
 0x3cb   :  { %v718_v41 = vadd.f32 %v786_v39, %v717_v40  ;;  %v844_v42 = vpop.f32.mrb[9].mxu0 }
 0x3cc   :  { %v720_v43 = vpop.f32.mrb[10].mxu0 }
 0x3cd   :  { %v723_v44 = vpack.c.bf16 %v718_v41, %v718_v41  ;;  %v845_v45 = vpop.f32.mrb[11].mxu0 }
 0x3cf   :  { %724 = vst [vmem:[%s1217_s9] sm:$0xf] %v723_v44 }
 0x3d0   :  { %729 = vsyncpa [#allocation3], 1 }
 0x3d1   :  { %730 = vsyncpa [#allocation5], 1 }
 0x3d2   :  { %731 = vsyncpa [#allocation8], 1 }

</bundles_post_ra>
